<compile_context>
chip_gen: v6e
topology: v6e:2x2x1
jax: 0.10.0
libtpu: 0.0.40
codegen_flags: <defaults>
</compile_context>

<pallas_src>
import functools
import math

import jax
import jax.numpy as jnp
from jax import lax
from jax.experimental import pallas as pl
from jax.experimental.pallas import tpu as pltpu


def _round_up(x, m):
    return (x + m - 1) // m * m


def _cdiv(a, b):
    return -(-a // b)


def _flash_attention_kernel(kmax_ref, kfull_ref,           # scalar prefetch (SMEM)
                            vl_ref, q_ref, k_ref, v_ref,    # inputs (VMEM)
                            o_ref,                          # output (VMEM)
                            q_sc, m_sc, l_sc, acc_sc,       # scratch (VMEM)
                            *, d_scale, tk):
    """Grid step (batch block b, q tile qi, k tile ki); ki innermost.

    kmax_ref / kfull_ref : (nb*nq,) int32 SMEM tables (scalar prefetch)
    vl_ref : (bb, tq, 1) int32 per-query valid lengths
    q_ref  : (bb, tq, D)   k_ref: (bb, tk, D)   v_ref: (bb, tk, Dv)
    o_ref  : (bb, tq, Dv)  written on the last *needed* k step
    q_sc   : (bb, tq, D) scaled-q scratch; m/l: (bb, tq, 1) f32; acc: (bb, tq, Dv) f32
    """
    b = pl.program_id(0)
    qi = pl.program_id(1)
    ki = pl.program_id(2)
    nq = pl.num_programs(1)

    idx = b * nq + qi
    n_needed = kmax_ref[idx]    # #k-tiles containing any valid key (>= 1)
    n_full = kfull_ref[idx]     # #k-tiles fully valid for every row of the block

    @pl.when(ki < n_needed)     # fully-masked tiles: no DMA (clamped index_map), no compute
    def _run():
        @pl.when(ki == 0)
        def _init():
            m_sc[...] = jnp.full_like(m_sc, -jnp.inf)
            l_sc[...] = jnp.zeros_like(l_sc)
            acc_sc[...] = jnp.zeros_like(acc_sc)
            # Hoisted q * 1/sqrt(d): the q block is resident across all ki steps.
            q_sc[...] = q_ref[...] * jnp.asarray(d_scale, dtype=q_ref.dtype)

        # Contract on the last dims directly -> no XLU transpose of k.
        s = jnp.einsum("bqd,bkd->bqk", q_sc[...], k_ref[...],
                       preferred_element_type=jnp.float32)

        def _update(scores):
            m_prev = m_sc[...]
            m_new = jnp.maximum(m_prev, jnp.max(scores, axis=-1, keepdims=True))
            alpha = jnp.exp(m_prev - m_new)
            p = jnp.exp(scores - m_new)
            l_sc[...] = alpha * l_sc[...] + jnp.sum(p, axis=-1, keepdims=True)
            acc_sc[...] = alpha * acc_sc[...] + jnp.einsum(
                "bqk,bkv->bqv", p.astype(v_ref.dtype), v_ref[...],
                preferred_element_type=jnp.float32)
            m_sc[...] = m_new

        @pl.when(ki >= n_full)      # boundary tile: apply the per-row key mask
        def _boundary():
            key_idx = ki * tk + lax.broadcasted_iota(jnp.int32, (1, 1, tk), 2)
            _update(jnp.where(key_idx < vl_ref[...], s, jnp.float32(-1e6)))

        @pl.when(ki < n_full)       # interior tile: all keys valid, skip mask VPU work
        def _interior():
            _update(s)

        @pl.when(ki == n_needed - 1)
        def _finalize():
            inv_l = pl.reciprocal(l_sc[...], approx=True)   # EUP slot, frees VALU
            o_ref[...] = (acc_sc[...] * inv_l).astype(o_ref.dtype)


def _tpu_params():
    """Generation-aware tile caps and VMEM budget/limit."""
    try:
        kind = jax.devices()[0].device_kind.lower()
    except Exception:
        kind = ""
    if "v7" in kind or "tpu7" in kind:
        # 64 MiB VMEM per TensorCore: keep documented headroom.
        return dict(tq_cap=256, tk_cap=512, budget=36 << 20, vmem_limit=48 << 20)
    if "v6" in kind:
        # 128 MiB VMEM: use it — bigger tiles cut K/V re-fetch traffic.
        return dict(tq_cap=512, tk_cap=512, budget=64 << 20, vmem_limit=96 << 20)
    if "v5" in kind:
        # v5e/v5p: 128 MiB VMEM, 128-wide MXU; large tk amortizes acc rescale.
        return dict(tq_cap=256, tk_cap=512, budget=64 << 20, vmem_limit=96 << 20)
    if "v4" in kind:
        return dict(tq_cap=256, tk_cap=512, budget=24 << 20, vmem_limit=32 << 20)
    if "v2" in kind or "v3" in kind:
        return dict(tq_cap=128, tk_cap=256, budget=10 << 20, vmem_limit=14 << 20)
    # Unknown: conservative defaults that fit every generation.
    return dict(tq_cap=256, tk_cap=512, budget=24 << 20, vmem_limit=32 << 20)


def dot_product_attention(queries, keys, values, valid_lens=None):
    """queries (B,Q,D), keys (B,K,D), values (B,K,Dv); valid_lens None, (B,) or (B,Q)."""
    queries = jnp.asarray(queries)
    keys = jnp.asarray(keys)
    values = jnp.asarray(values)

    B, Q, D = queries.shape
    _, K, _ = keys.shape
    Dv = values.shape[-1]
    dtype = queries.dtype
    itemsize = jnp.dtype(dtype).itemsize
    d_scale = 1.0 / math.sqrt(D)

    # ---- normalize valid_lens to (B, Q) int32 ----
    if valid_lens is None:
        vl = jnp.full((B, Q), K, dtype=jnp.int32)
    else:
        vl = jnp.asarray(valid_lens).astype(jnp.int32)
        if vl.ndim == 1:
            vl = jnp.broadcast_to(vl[:, None], (B, Q))
        vl = vl.reshape(B, Q)

    # ---- tiles (last dims D / Dv left unpadded; blocks use the full dim) ----
    hw = _tpu_params()
    sub = {4: 8, 2: 16, 1: 32}.get(itemsize, 8)   # sublane multiple per dtype
    tq = min(_round_up(Q, sub), hw["tq_cap"])
    tk = min(_round_up(K, sub), hw["tk_cap"])

    # VMEM accounting uses lane-padded (on-chip) sizes, HBM traffic stays unpadded.
    d_l = _round_up(D, 128)
    dv_l = _round_up(Dv, 128)

    def per_b_bytes(tq_, tk_):
        return (2 * itemsize * tq_ * d_l          # q (double-buffered)
                + 2 * itemsize * tk_ * d_l        # k (double-buffered)
                + 2 * itemsize * tk_ * dv_l       # v (double-buffered)
                + 2 * 4 * tq_ * 128               # valid_lens block (lane-padded)
                + 2 * itemsize * tq_ * dv_l       # output (double-buffered)
                + itemsize * tq_ * d_l            # scaled-q scratch
                + 4 * tq_ * dv_l                  # f32 acc scratch
                + 2 * 4 * tq_ * 128)              # f32 m / l scratch

    # Shrink tiles only if a single batch row would blow the budget.
    while per_b_bytes(tq, tk) > hw["budget"] and (tq > sub or tk > sub):
        if tk >= tq and tk > sub:
            tk = max(sub, _round_up(tk // 2, sub))
        else:
            tq = max(sub, _round_up(tq // 2, sub))

    q_pad = _round_up(Q, tq)
    k_pad = _round_up(K, tk)

    # Prefer large tq over large bb; bb just soaks up the remaining budget.
    # Only force >=2 batch grid steps (megacore) when the q axis cannot feed
    # the second TensorCore by itself.
    bb = max(1, min(B, hw["budget"] // per_b_bytes(tq, tk)))
    if q_pad // tq < 2:
        while bb > 1 and _cdiv(B, bb) < 2:
            bb -= 1
    b_pad = _round_up(B, bb)

    nb, nq, nk = b_pad // bb, q_pad // tq, k_pad // tk

    # ---- pad batch / seq axes only (padded keys are masked; padded query /
    # batch rows are sliced off) ----
    q_p = jnp.pad(queries, ((0, b_pad - B), (0, q_pad - Q), (0, 0)))
    k_p = jnp.pad(keys, ((0, b_pad - B), (0, k_pad - K), (0, 0)))
    v_p = jnp.pad(values, ((0, b_pad - B), (0, k_pad - K), (0, 0)))

    # Per-query valid lens (VMEM block, used only on boundary tiles).  Padded
    # rows get 0 so they never add work; their outputs are discarded.
    vl_pad0 = jnp.pad(vl, ((0, b_pad - B), (0, q_pad - Q)))
    vl_in = vl_pad0.reshape(b_pad, q_pad, 1)

    # ---- scalar-prefetch tables per (batch-block, q-tile) ----
    #   kmax  = #k-tiles containing any valid key (clamped >= 1 so every block
    #           still initializes and writes its output)
    #   kfull = #k-tiles fully valid for every row (mask skipped there)
    vl_padK = jnp.pad(vl, ((0, b_pad - B), (0, q_pad - Q)), constant_values=K)
    max_blk = vl_pad0.reshape(nb, bb, nq, tq).max(axis=(1, 3))
    min_blk = vl_padK.reshape(nb, bb, nq, tq).min(axis=(1, 3))
    kmax = jnp.maximum((max_blk + tk - 1) // tk, 1).astype(jnp.int32).reshape(-1)
    kfull = (min_blk // tk).astype(jnp.int32).reshape(-1)

    def _qo_map(b, qi, ki, kmax_ref, kfull_ref):
        return (b, qi, 0)

    def _kv_map(b, qi, ki, kmax_ref, kfull_ref):
        # Clamp to the last needed k-tile: skipped steps re-use the resident
        # block, so no DMA is issued for fully-masked tiles.
        return (b, jnp.minimum(ki, kmax_ref[b * nq + qi] - 1), 0)

    kernel = functools.partial(_flash_attention_kernel, d_scale=d_scale, tk=tk)

    out_padded = pl.pallas_call(
        kernel,
        out_shape=jax.ShapeDtypeStruct((b_pad, q_pad, Dv), dtype),
        grid_spec=pltpu.PrefetchScalarGridSpec(
            num_scalar_prefetch=2,
            grid=(nb, nq, nk),
            in_specs=[
                pl.BlockSpec((bb, tq, 1), _qo_map),
                pl.BlockSpec((bb, tq, D), _qo_map),
                pl.BlockSpec((bb, tk, D), _kv_map),
                pl.BlockSpec((bb, tk, Dv), _kv_map),
            ],
            out_specs=pl.BlockSpec((bb, tq, Dv), _qo_map),
            scratch_shapes=[
                pltpu.VMEM((bb, tq, D), dtype),         # scaled q
                pltpu.VMEM((bb, tq, 1), jnp.float32),   # m
                pltpu.VMEM((bb, tq, 1), jnp.float32),   # l
                pltpu.VMEM((bb, tq, Dv), jnp.float32),  # acc
            ],
        ),
        compiler_params=pltpu.CompilerParams(
            dimension_semantics=("parallel", "parallel", "arbitrary"),
            vmem_limit_bytes=hw["vmem_limit"],
        ),
    )(kmax, kfull, vl_in, q_p, k_p, v_p)

    return out_padded[:B, :Q, :]


def _reference(queries, keys, values, valid_lens):
    d = queries.shape[-1]
    scores = jnp.einsum("bqd,bkd->bqk", queries, keys) / math.sqrt(d)
    if valid_lens is not None:
        vl = jnp.asarray(valid_lens)
        if vl.ndim == 1:
            vl = jnp.broadcast_to(vl[:, None], scores.shape[:2])
        key_idx = jnp.arange(keys.shape[1])[None, None, :]
        scores = jnp.where(key_idx < vl[:, :, None], scores, -1e6)
    weights = jax.nn.softmax(scores, axis=-1)
    return jnp.einsum("bqk,bkv->bqv", weights, values)


if __name__ == "__main__":
    key = jax.random.PRNGKey(0)
    kq, kk, kv = jax.random.split(key, 3)

    B, Q, K, D, Dv = 2, 8, 8, 32, 32
    queries = jax.random.normal(kq, (B, Q, D), dtype=jnp.float32)
    keys = jax.random.normal(kk, (B, K, D), dtype=jnp.float32)
    values = jax.random.normal(kv, (B, K, Dv), dtype=jnp.float32)

    # (B,) valid_lens (per-batch lengths, as in the d2l example)
    valid_lens_1d = jnp.array([3, 6], dtype=jnp.int32)
    out = jax.block_until_ready(dot_product_attention(queries, keys, values, valid_lens_1d))
    ref = _reference(queries, keys, values, valid_lens_1d)
    assert out.shape == (B, Q, Dv)
    assert jnp.allclose(out, ref, atol=2e-3, rtol=2e-3), "mismatch (1D valid_lens)"

    # (B, Q) per-query valid_lens
    valid_lens_2d = jnp.tile(jnp.arange(1, Q + 1, dtype=jnp.int32)[None, :], (B, 1))
    out2 = jax.block_until_ready(dot_product_attention(queries, keys, values, valid_lens_2d))
    ref2 = _reference(queries, keys, values, valid_lens_2d)
    assert jnp.allclose(out2, ref2, atol=2e-3, rtol=2e-3), "mismatch (2D valid_lens)"

    # no mask
    out3 = jax.block_until_ready(dot_product_attention(queries, keys, values, None))
    ref3 = _reference(queries, keys, values, None)
    assert jnp.allclose(out3, ref3, atol=2e-3, rtol=2e-3), "mismatch (no mask)"

    print("KERNEL_OK")
</pallas_src>

<mosaic_0001>
module attributes {stable_mosaic.version = 11 : i64} {
  func.func @_flash_attention_kernel(%arg0: i32, %arg1: i32, %arg2: i32, %arg3: memref<2xi32, #tpu.memory_space<smem>>, %arg4: memref<2xi32, #tpu.memory_space<smem>>, %arg5: memref<1x8x1xi32, #tpu.memory_space<vmem>>, %arg6: memref<1x8x32xf32, #tpu.memory_space<vmem>>, %arg7: memref<1x8x32xf32, #tpu.memory_space<vmem>>, %arg8: memref<1x8x32xf32, #tpu.memory_space<vmem>>, %arg9: memref<1x8x32xf32, #tpu.memory_space<vmem>>, %arg10: memref<1x8x32xf32, #tpu.memory_space<vmem>>, %arg11: memref<1x8x1xf32, #tpu.memory_space<vmem>>, %arg12: memref<1x8x1xf32, #tpu.memory_space<vmem>>, %arg13: memref<1x8x32xf32, #tpu.memory_space<vmem>>) attributes {dimension_semantics = [#tpu.dimension_semantics<parallel>, #tpu.dimension_semantics<parallel>, #tpu.dimension_semantics<arbitrary>], iteration_bounds = array<i64: 2, 1, 1>, scalar_prefetch = 2 : i64, scratch_operands = 4 : i64, tpu.core_type = #tpu.core_type<tc>, window_params = [{transform_indices = @transform_0, window_bounds = array<i64: 1, 8, 1>}, {transform_indices = @transform_1, window_bounds = array<i64: 1, 8, 32>}, {transform_indices = @transform_2, window_bounds = array<i64: 1, 8, 32>}, {transform_indices = @transform_3, window_bounds = array<i64: 1, 8, 32>}, {transform_indices = @transform_4, window_bounds = array<i64: 1, 8, 32>}]} {
    %c1_i32 = arith.constant 1 : i32
    %0 = arith.muli %arg0, %c1_i32 : i32
    %1 = arith.addi %0, %arg1 : i32
    %2 = arith.index_cast %1 : i32 to index
    %3 = memref.load %arg3[%2] : memref<2xi32, #tpu.memory_space<smem>>
    %4 = arith.index_cast %1 : i32 to index
    %5 = memref.load %arg4[%4] : memref<2xi32, #tpu.memory_space<smem>>
    %6 = arith.cmpi slt, %arg2, %3 : i32
    %7 = arith.extui %6 : i1 to i32
    %c0_i32 = arith.constant 0 : i32
    %8 = arith.cmpi ne, %7, %c0_i32 : i32
    scf.if %8 {
      %c0_i32_0 = arith.constant 0 : i32
      %9 = arith.cmpi eq, %arg2, %c0_i32_0 : i32
      %10 = arith.extui %9 : i1 to i32
      %c0_i32_1 = arith.constant 0 : i32
      %11 = arith.cmpi ne, %10, %c0_i32_1 : i32
      scf.if %11 {
        %cst_11 = arith.constant 0xFF800000 : f32
        %25 = vector.broadcast %cst_11 : f32 to vector<1x8x1xf32>
        %c0_12 = arith.constant 0 : index
        %c0_13 = arith.constant 0 : index
        %c0_14 = arith.constant 0 : index
        %26 = vector.load %arg11[%c0_12, %c0_13, %c0_14] : memref<1x8x1xf32, #tpu.memory_space<vmem>>, vector<1x8x1xf32>
        tpu.vector_store %arg11[%c0_12, %c0_13, %c0_14], %25 {strides = array<i32>} : memref<1x8x1xf32, #tpu.memory_space<vmem>>, vector<1x8x1xf32>,
        %cst_15 = arith.constant 0.000000e+00 : f32
        %27 = vector.broadcast %cst_15 : f32 to vector<1x8x1xf32>
        %c0_16 = arith.constant 0 : index
        %c0_17 = arith.constant 0 : index
        %c0_18 = arith.constant 0 : index
        %28 = vector.load %arg12[%c0_16, %c0_17, %c0_18] : memref<1x8x1xf32, #tpu.memory_space<vmem>>, vector<1x8x1xf32>
        tpu.vector_store %arg12[%c0_16, %c0_17, %c0_18], %27 {strides = array<i32>} : memref<1x8x1xf32, #tpu.memory_space<vmem>>, vector<1x8x1xf32>,
        %cst_19 = arith.constant 0.000000e+00 : f32
        %29 = vector.broadcast %cst_19 : f32 to vector<1x8x32xf32>
        %c0_20 = arith.constant 0 : index
        %c0_21 = arith.constant 0 : index
        %c0_22 = arith.constant 0 : index
        %30 = vector.load %arg13[%c0_20, %c0_21, %c0_22] : memref<1x8x32xf32, #tpu.memory_space<vmem>>, vector<1x8x32xf32>
        tpu.vector_store %arg13[%c0_20, %c0_21, %c0_22], %29 {strides = array<i32>} : memref<1x8x32xf32, #tpu.memory_space<vmem>>, vector<1x8x32xf32>,
        %c0_23 = arith.constant 0 : index
        %c0_24 = arith.constant 0 : index
        %c0_25 = arith.constant 0 : index
        %31 = vector.load %arg6[%c0_23, %c0_24, %c0_25] : memref<1x8x32xf32, #tpu.memory_space<vmem>>, vector<1x8x32xf32>
        %cst_26 = arith.constant 0.176776692 : f32
        %32 = vector.broadcast %cst_26 : f32 to vector<1x8x32xf32>
        %33 = arith.mulf %31, %32 : vector<1x8x32xf32>
        %c0_27 = arith.constant 0 : index
        %c0_28 = arith.constant 0 : index
        %c0_29 = arith.constant 0 : index
        %34 = vector.load %arg10[%c0_27, %c0_28, %c0_29] : memref<1x8x32xf32, #tpu.memory_space<vmem>>, vector<1x8x32xf32>
        tpu.vector_store %arg10[%c0_27, %c0_28, %c0_29], %33 {strides = array<i32>} : memref<1x8x32xf32, #tpu.memory_space<vmem>>, vector<1x8x32xf32>,
      } else {
      }
      %c0 = arith.constant 0 : index
      %c0_2 = arith.constant 0 : index
      %c0_3 = arith.constant 0 : index
      %12 = vector.load %arg10[%c0, %c0_2, %c0_3] : memref<1x8x32xf32, #tpu.memory_space<vmem>>, vector<1x8x32xf32>
      %c0_4 = arith.constant 0 : index
      %c0_5 = arith.constant 0 : index
      %c0_6 = arith.constant 0 : index
      %13 = vector.load %arg7[%c0_4, %c0_5, %c0_6] : memref<1x8x32xf32, #tpu.memory_space<vmem>>, vector<1x8x32xf32>
      "tpu.trace_start"() <{level = 10 : i32, message = "bqd,bkd->bqk"}> : () -> ()
      %cst = arith.constant dense<0.000000e+00> : vector<1x8x8xf32>
      %14 = tpu.matmul %12, %13, %cst {dimension_numbers = #tpu.dot_dimension_numbers<[2], [2], [1], [1], [0, 0, 0, 1, 1, 1], [0], [0]>} : vector<1x8x32xf32>, vector<1x8x32xf32>, vector<1x8x8xf32> -> vector<1x8x8xf32>
      "tpu.trace_stop"() : () -> ()
      %15 = arith.cmpi sge, %arg2, %5 : i32
      %16 = arith.extui %15 : i1 to i32
      %c0_i32_7 = arith.constant 0 : i32
      %17 = arith.cmpi ne, %16, %c0_i32_7 : i32
      scf.if %17 {
        %c8_i32 = arith.constant 8 : i32
        %25 = arith.muli %arg2, %c8_i32 : i32
        %26 = tpu.iota {dimensions = array<i32: 2>} : vector<1x1x8xi32>
        %27 = vector.broadcast %25 : i32 to vector<1x1x8xi32>
        %28 = arith.addi %27, %26 : vector<1x1x8xi32>
        %c0_11 = arith.constant 0 : index
        %c0_12 = arith.constant 0 : index
        %c0_13 = arith.constant 0 : index
        %29 = vector.load %arg5[%c0_11, %c0_12, %c0_13] : memref<1x8x1xi32, #tpu.memory_space<vmem>>, vector<1x8x1xi32>
        %30 = vector.broadcast %28 : vector<1x1x8xi32> to vector<1x8x8xi32>
        %31 = vector.broadcast %29 : vector<1x8x1xi32> to vector<1x8x8xi32>
        %32 = arith.cmpi slt, %30, %31 : vector<1x8x8xi32>
        %cst_14 = arith.constant -1.000000e+06 : f32
        %33 = vector.broadcast %cst_14 : f32 to vector<1x8x8xf32>
        %34 = arith.select %32, %14, %33 : vector<1x8x8xi1>, vector<1x8x8xf32>
        %c0_15 = arith.constant 0 : index
        %c0_16 = arith.constant 0 : index
        %c0_17 = arith.constant 0 : index
        %35 = vector.load %arg11[%c0_15, %c0_16, %c0_17] : memref<1x8x1xf32, #tpu.memory_space<vmem>>, vector<1x8x1xf32>
        %cst_18 = arith.constant dense<0xFF800000> : vector<1x8xf32>
        %36 = vector.multi_reduction <maximumf>, %34, %cst_18 [2] : vector<1x8x8xf32> to vector<1x8xf32>
        %37 = vector.shape_cast %36 : vector<1x8xf32> to vector<1x8x1xf32>
        %38 = arith.maximumf %35, %37 : vector<1x8x1xf32>
        %39 = arith.subf %35, %38 : vector<1x8x1xf32>
        %40 = math.exp %39 : vector<1x8x1xf32>
        %41 = vector.broadcast %38 : vector<1x8x1xf32> to vector<1x8x8xf32>
        %42 = arith.subf %34, %41 : vector<1x8x8xf32>
        %43 = math.exp %42 : vector<1x8x8xf32>
        %c0_19 = arith.constant 0 : index
        %c0_20 = arith.constant 0 : index
        %c0_21 = arith.constant 0 : index
        %44 = vector.load %arg12[%c0_19, %c0_20, %c0_21] : memref<1x8x1xf32, #tpu.memory_space<vmem>>, vector<1x8x1xf32>
        %45 = arith.mulf %40, %44 : vector<1x8x1xf32>
        %cst_22 = arith.constant dense<0.000000e+00> : vector<1x8xf32>
        %46 = vector.multi_reduction <add>, %43, %cst_22 [2] : vector<1x8x8xf32> to vector<1x8xf32>
        %47 = vector.shape_cast %46 : vector<1x8xf32> to vector<1x8x1xf32>
        %48 = arith.addf %45, %47 : vector<1x8x1xf32>
        %c0_23 = arith.constant 0 : index
        %c0_24 = arith.constant 0 : index
        %c0_25 = arith.constant 0 : index
        %49 = vector.load %arg12[%c0_23, %c0_24, %c0_25] : memref<1x8x1xf32, #tpu.memory_space<vmem>>, vector<1x8x1xf32>
        tpu.vector_store %arg12[%c0_23, %c0_24, %c0_25], %48 {strides = array<i32>} : memref<1x8x1xf32, #tpu.memory_space<vmem>>, vector<1x8x1xf32>,
        %c0_26 = arith.constant 0 : index
        %c0_27 = arith.constant 0 : index
        %c0_28 = arith.constant 0 : index
        %50 = vector.load %arg13[%c0_26, %c0_27, %c0_28] : memref<1x8x32xf32, #tpu.memory_space<vmem>>, vector<1x8x32xf32>
        %51 = vector.broadcast %40 : vector<1x8x1xf32> to vector<1x8x32xf32>
        %52 = arith.mulf %51, %50 : vector<1x8x32xf32>
        %c0_29 = arith.constant 0 : index
        %c0_30 = arith.constant 0 : index
        %c0_31 = arith.constant 0 : index
        %53 = vector.load %arg8[%c0_29, %c0_30, %c0_31] : memref<1x8x32xf32, #tpu.memory_space<vmem>>, vector<1x8x32xf32>
        "tpu.trace_start"() <{level = 10 : i32, message = "bqk,bkv->bqv"}> : () -> ()
        %cst_32 = arith.constant dense<0.000000e+00> : vector<1x8x32xf32>
        %54 = tpu.matmul %43, %53, %cst_32 {dimension_numbers = #tpu.dot_dimension_numbers<[2], [1], [1], [2], [0, 0, 0, 1, 1, 2], [0], [0]>} : vector<1x8x8xf32>, vector<1x8x32xf32>, vector<1x8x32xf32> -> vector<1x8x32xf32>
        "tpu.trace_stop"() : () -> ()
        %55 = arith.addf %52, %54 : vector<1x8x32xf32>
        %c0_33 = arith.constant 0 : index
        %c0_34 = arith.constant 0 : index
        %c0_35 = arith.constant 0 : index
        %56 = vector.load %arg13[%c0_33, %c0_34, %c0_35] : memref<1x8x32xf32, #tpu.memory_space<vmem>>, vector<1x8x32xf32>
        tpu.vector_store %arg13[%c0_33, %c0_34, %c0_35], %55 {strides = array<i32>} : memref<1x8x32xf32, #tpu.memory_space<vmem>>, vector<1x8x32xf32>,
        %c0_36 = arith.constant 0 : index
        %c0_37 = arith.constant 0 : index
        %c0_38 = arith.constant 0 : index
        %57 = vector.load %arg11[%c0_36, %c0_37, %c0_38] : memref<1x8x1xf32, #tpu.memory_space<vmem>>, vector<1x8x1xf32>
        tpu.vector_store %arg11[%c0_36, %c0_37, %c0_38], %38 {strides = array<i32>} : memref<1x8x1xf32, #tpu.memory_space<vmem>>, vector<1x8x1xf32>,
      } else {
      }
      %18 = arith.cmpi slt, %arg2, %5 : i32
      %19 = arith.extui %18 : i1 to i32
      %c0_i32_8 = arith.constant 0 : i32
      %20 = arith.cmpi ne, %19, %c0_i32_8 : i32
      scf.if %20 {
        %c0_11 = arith.constant 0 : index
        %c0_12 = arith.constant 0 : index
        %c0_13 = arith.constant 0 : index
        %25 = vector.load %arg11[%c0_11, %c0_12, %c0_13] : memref<1x8x1xf32, #tpu.memory_space<vmem>>, vector<1x8x1xf32>
        %cst_14 = arith.constant dense<0xFF800000> : vector<1x8xf32>
        %26 = vector.multi_reduction <maximumf>, %14, %cst_14 [2] : vector<1x8x8xf32> to vector<1x8xf32>
        %27 = vector.shape_cast %26 : vector<1x8xf32> to vector<1x8x1xf32>
        %28 = arith.maximumf %25, %27 : vector<1x8x1xf32>
        %29 = arith.subf %25, %28 : vector<1x8x1xf32>
        %30 = math.exp %29 : vector<1x8x1xf32>
        %31 = vector.broadcast %28 : vector<1x8x1xf32> to vector<1x8x8xf32>
        %32 = arith.subf %14, %31 : vector<1x8x8xf32>
        %33 = math.exp %32 : vector<1x8x8xf32>
        %c0_15 = arith.constant 0 : index
        %c0_16 = arith.constant 0 : index
        %c0_17 = arith.constant 0 : index
        %34 = vector.load %arg12[%c0_15, %c0_16, %c0_17] : memref<1x8x1xf32, #tpu.memory_space<vmem>>, vector<1x8x1xf32>
        %35 = arith.mulf %30, %34 : vector<1x8x1xf32>
        %cst_18 = arith.constant dense<0.000000e+00> : vector<1x8xf32>
        %36 = vector.multi_reduction <add>, %33, %cst_18 [2] : vector<1x8x8xf32> to vector<1x8xf32>
        %37 = vector.shape_cast %36 : vector<1x8xf32> to vector<1x8x1xf32>
        %38 = arith.addf %35, %37 : vector<1x8x1xf32>
        %c0_19 = arith.constant 0 : index
        %c0_20 = arith.constant 0 : index
        %c0_21 = arith.constant 0 : index
        %39 = vector.load %arg12[%c0_19, %c0_20, %c0_21] : memref<1x8x1xf32, #tpu.memory_space<vmem>>, vector<1x8x1xf32>
        tpu.vector_store %arg12[%c0_19, %c0_20, %c0_21], %38 {strides = array<i32>} : memref<1x8x1xf32, #tpu.memory_space<vmem>>, vector<1x8x1xf32>,
        %c0_22 = arith.constant 0 : index
        %c0_23 = arith.constant 0 : index
        %c0_24 = arith.constant 0 : index
        %40 = vector.load %arg13[%c0_22, %c0_23, %c0_24] : memref<1x8x32xf32, #tpu.memory_space<vmem>>, vector<1x8x32xf32>
        %41 = vector.broadcast %30 : vector<1x8x1xf32> to vector<1x8x32xf32>
        %42 = arith.mulf %41, %40 : vector<1x8x32xf32>
        %c0_25 = arith.constant 0 : index
        %c0_26 = arith.constant 0 : index
        %c0_27 = arith.constant 0 : index
        %43 = vector.load %arg8[%c0_25, %c0_26, %c0_27] : memref<1x8x32xf32, #tpu.memory_space<vmem>>, vector<1x8x32xf32>
        "tpu.trace_start"() <{level = 10 : i32, message = "bqk,bkv->bqv"}> : () -> ()
        %cst_28 = arith.constant dense<0.000000e+00> : vector<1x8x32xf32>
        %44 = tpu.matmul %33, %43, %cst_28 {dimension_numbers = #tpu.dot_dimension_numbers<[2], [1], [1], [2], [0, 0, 0, 1, 1, 2], [0], [0]>} : vector<1x8x8xf32>, vector<1x8x32xf32>, vector<1x8x32xf32> -> vector<1x8x32xf32>
        "tpu.trace_stop"() : () -> ()
        %45 = arith.addf %42, %44 : vector<1x8x32xf32>
        %c0_29 = arith.constant 0 : index
        %c0_30 = arith.constant 0 : index
        %c0_31 = arith.constant 0 : index
        %46 = vector.load %arg13[%c0_29, %c0_30, %c0_31] : memref<1x8x32xf32, #tpu.memory_space<vmem>>, vector<1x8x32xf32>
        tpu.vector_store %arg13[%c0_29, %c0_30, %c0_31], %45 {strides = array<i32>} : memref<1x8x32xf32, #tpu.memory_space<vmem>>, vector<1x8x32xf32>,
        %c0_32 = arith.constant 0 : index
        %c0_33 = arith.constant 0 : index
        %c0_34 = arith.constant 0 : index
        %47 = vector.load %arg11[%c0_32, %c0_33, %c0_34] : memref<1x8x1xf32, #tpu.memory_space<vmem>>, vector<1x8x1xf32>
        tpu.vector_store %arg11[%c0_32, %c0_33, %c0_34], %28 {strides = array<i32>} : memref<1x8x1xf32, #tpu.memory_space<vmem>>, vector<1x8x1xf32>,
      } else {
      }
      %c1_i32_9 = arith.constant 1 : i32
      %21 = arith.subi %3, %c1_i32_9 : i32
      %22 = arith.cmpi eq, %arg2, %21 : i32
      %23 = arith.extui %22 : i1 to i32
      %c0_i32_10 = arith.constant 0 : i32
      %24 = arith.cmpi ne, %23, %c0_i32_10 : i32
      scf.if %24 {
        %c0_11 = arith.constant 0 : index
        %c0_12 = arith.constant 0 : index
        %c0_13 = arith.constant 0 : index
        %25 = vector.load %arg12[%c0_11, %c0_12, %c0_13] : memref<1x8x1xf32, #tpu.memory_space<vmem>>, vector<1x8x1xf32>
        %26 = tpu.reciprocal %25 {approx = true} : vector<1x8x1xf32> -> vector<1x8x1xf32>
        %c0_14 = arith.constant 0 : index
        %c0_15 = arith.constant 0 : index
        %c0_16 = arith.constant 0 : index
        %27 = vector.load %arg13[%c0_14, %c0_15, %c0_16] : memref<1x8x32xf32, #tpu.memory_space<vmem>>, vector<1x8x32xf32>
        %28 = vector.broadcast %26 : vector<1x8x1xf32> to vector<1x8x32xf32>
        %29 = arith.mulf %27, %28 : vector<1x8x32xf32>
        %c0_17 = arith.constant 0 : index
        %c0_18 = arith.constant 0 : index
        %c0_19 = arith.constant 0 : index
        %30 = vector.load %arg9[%c0_17, %c0_18, %c0_19] : memref<1x8x32xf32, #tpu.memory_space<vmem>>, vector<1x8x32xf32>
        tpu.vector_store %arg9[%c0_17, %c0_18, %c0_19], %29 {strides = array<i32>} : memref<1x8x32xf32, #tpu.memory_space<vmem>>, vector<1x8x32xf32>,
      } else {
      }
    } else {
    }
    return
  }
  func.func @transform_0(%arg0: i32, %arg1: i32, %arg2: i32, %arg3: memref<2xi32, #tpu.memory_space<smem>>, %arg4: memref<2xi32, #tpu.memory_space<smem>>) -> (i32, i32, i32) {
    %c0_i32 = arith.constant 0 : i32
    %c0_i32_0 = arith.constant 0 : i32
    return %arg0, %arg1, %c0_i32 : i32, i32, i32
  }
  func.func @transform_1(%arg0: i32, %arg1: i32, %arg2: i32, %arg3: memref<2xi32, #tpu.memory_space<smem>>, %arg4: memref<2xi32, #tpu.memory_space<smem>>) -> (i32, i32, i32) {
    %c0_i32 = arith.constant 0 : i32
    %c0_i32_0 = arith.constant 0 : i32
    return %arg0, %arg1, %c0_i32 : i32, i32, i32
  }
  func.func @transform_2(%arg0: i32, %arg1: i32, %arg2: i32, %arg3: memref<2xi32, #tpu.memory_space<smem>>, %arg4: memref<2xi32, #tpu.memory_space<smem>>) -> (i32, i32, i32) {
    %c1_i32 = arith.constant 1 : i32
    %0 = arith.muli %arg0, %c1_i32 : i32
    %1 = arith.addi %0, %arg1 : i32
    %2 = arith.index_cast %1 : i32 to index
    %3 = memref.load %arg3[%2] : memref<2xi32, #tpu.memory_space<smem>>
    %c1_i32_0 = arith.constant 1 : i32
    %4 = arith.subi %3, %c1_i32_0 : i32
    %5 = arith.minsi %arg2, %4 : i32
    %c0_i32 = arith.constant 0 : i32
    %c0_i32_1 = arith.constant 0 : i32
    return %arg0, %5, %c0_i32 : i32, i32, i32
  }
  func.func @transform_3(%arg0: i32, %arg1: i32, %arg2: i32, %arg3: memref<2xi32, #tpu.memory_space<smem>>, %arg4: memref<2xi32, #tpu.memory_space<smem>>) -> (i32, i32, i32) {
    %c1_i32 = arith.constant 1 : i32
    %0 = arith.muli %arg0, %c1_i32 : i32
    %1 = arith.addi %0, %arg1 : i32
    %2 = arith.index_cast %1 : i32 to index
    %3 = memref.load %arg3[%2] : memref<2xi32, #tpu.memory_space<smem>>
    %c1_i32_0 = arith.constant 1 : i32
    %4 = arith.subi %3, %c1_i32_0 : i32
    %5 = arith.minsi %arg2, %4 : i32
    %c0_i32 = arith.constant 0 : i32
    %c0_i32_1 = arith.constant 0 : i32
    return %arg0, %5, %c0_i32 : i32, i32, i32
  }
  func.func @transform_4(%arg0: i32, %arg1: i32, %arg2: i32, %arg3: memref<2xi32, #tpu.memory_space<smem>>, %arg4: memref<2xi32, #tpu.memory_space<smem>>) -> (i32, i32, i32) {
    %c0_i32 = arith.constant 0 : i32
    %c0_i32_0 = arith.constant 0 : i32
    return %arg0, %arg1, %c0_i32 : i32, i32, i32
  }
}

</mosaic_0001>

<bundles_post_ra>
// kernel: tpu_custom_call.1
= control target key start
LH: loop header
LB: loop body
LE: loop exit
PB: predicated region body
PF: predicated region fallthrough
CT: control target
= control target key end

     0   :  { %s1733_s0 = inlined_call_operand.vmem [shape: s32[2], index: 0, kind: input, shape index: {}]   ;;  %s1734_s2 = inlined_call_operand.vmem [shape: s32[2,8,1], index: 2, kind: input, shape index: {}]   ;;  %s1735_s3 = inlined_call_operand.vmem [shape: f32[2,8,32], index: 3, kind: input, shape index: {}]   ;;  %s1736_s4 = inlined_call_operand.hbm [shape: f32[2,8,32], index: 4, kind: input, shape index: {}]   ;;  %s1737_s5 = inlined_call_operand.hbm [shape: f32[2,8,32], index: 5, kind: input, shape index: {}]   ;;  %s1738_s6 = inlined_call_operand.hbm [shape: f32[2,8,32], index: 6, kind: output, shape index: {}]   ;;  %s1739_s1 = inlined_call_operand.vmem [shape: s32[2], index: 1, kind: input, shape index: {}]  }
   0x1   :  { %1755 = sst [smem:[#allocation31_spill]] %s1734_s2  ;;  %s11_s23 = sshll.u32 %s1733_s0, 4  ;;  %s12_s23 = int_to_ptr.vmem [resolvable:$true] %s11_s23 }
   0x2   :  { %1756 = sst [smem:[#allocation32_spill]] %s1735_s3  ;;  %s15_s26 = sshll.u32 %s1739_s1, 4  ;;  %s16_s26 = int_to_ptr.vmem [resolvable:$true] %s15_s26 }
   0x3   :  { %1757 = sst [smem:[#allocation33_spill]] %s1738_s6  ;;  %s1101_s27 = scalar_lea.vmem %s12_s23, 16 }
   0x4   :  { %p1102_p0 = scmp.ne.s32.totalorder %s12_s23, %s1101_s27  ;;  %p1106_p1 = scmp.lt.s32.totalorder %s12_s23, %s12_s23 }
   0x5   :  { %p1107_p2 = scmp.lt.s32.totalorder %s1101_s27, %s1101_s27 }
   0x7   :  { %p1108_p3 = por %p1107_p2, %p1106_p1 }
   0x9   :  { %p1109_p4 = pnand %p1108_p3, %p1102_p0 }
   0xb   :  { %1112 = shalt.err (!%p1109_p4)  }
   0xc   :  { %s1317_s28 = smov [#allocation7]   ;;  %s1113_s29 = scalar_lea.vmem %s16_s26, 16 }
   0xd   :  { %14 = dma.vmem_to_smem %s12_s23, 16, %s1317_s28, [#allocation6] }
   0xe   :  { %p1114_p5 = scmp.ne.s32.totalorder %s16_s26, %s1113_s29  ;;  %p1118_p6 = scmp.lt.s32.totalorder %s16_s26, %s16_s26 }
   0xf   :  { %p1119_p7 = scmp.lt.s32.totalorder %s1113_s29, %s1113_s29 }
  0x11   :  { %p1120_p8 = por %p1119_p7, %p1118_p6 }
  0x13   :  { %p1121_p9 = pnand %p1120_p8, %p1114_p5 }
  0x15   :  { %1124 = shalt.err (!%p1121_p9)  }
  0x16   :  { %s1318_s0 = smov [#allocation8]  }
  0x17   :  { %18 = dma.vmem_to_smem %s16_s26, 16, %s1318_s0, [#allocation6] }
  0x18   :  { %1255 = dma.done.wait [#allocation6], 32 }
  0x19   :  { %1256 = vsyncadd [#allocation6], 4294967264 }
  0x1a   :  { %20 = sfence }
  0x1b   :  { %21 = vsyncpa [#allocation10], 0 }
  0x1c   :  { %23 = vsyncpa [#allocation10 + $0x1], 0 }
  0x1d   :  { %24 = vsyncpa [#allocation13], 0 }
  0x1e   :  { %26 = vsyncpa [#allocation13 + $0x1], 0 }
  0x1f   :  { %27 = vsyncpa [#allocation11], 0 }
  0x20   :  { %29 = vsyncpa [#allocation11 + $0x1], 0  ;;  %s1373_s1 = smov 0   ;;  %s1375_s30 = smov 0  }
  0x21   :  { %s1377_s7 = smov 0   ;;  %s1379_s8 = smov 0  }
  0x22   :  { %s1381_s9 = smov 0   ;;  %s1383_s10 = smov 0  }
  0x23   :  { %s1385_s11 = smov 0   ;;  %s1387_s12 = smov 0  }
  0x24   :  { %s1389_s13 = smov 0   ;;  %s1391_s14 = smov 0  }
  0x25   :  { %s1393_s15 = smov 0   ;;  %s1395_s16 = smov 0  }
  0x26 LB: > { %1758 = sst [smem:[#allocation23_spill]] %s1271_s1  ;;  %s887_s17 = sadd.s32 4294967295, %s1315_s16   ;;  %s1315_s16 = sphi %s1395_s16, %s35_s16   ;;  %s1311_s15 = sphi %s1393_s15, %s1810_s15   ;;  %s1307_s14 = sphi %s1391_s14, %s1809_s14   ;;  %s1303_s13 = sphi %s1389_s13, %s1808_s13   ;;  %s1299_s12 = sphi %s1387_s12, %s1807_s12   ;;  %s1295_s11 = sphi %s1385_s11, %s1806_s11   ;;  %s1291_s10 = sphi %s1383_s10, %s1805_s10   ;;  %s1287_s9 = sphi %s1381_s9, %s1804_s9   ;;  %s1283_s8 = sphi %s1379_s8, %s1803_s8   ;;  %s1279_s7 = sphi %s1377_s7, %s1798_s7   ;;  %s1275_s30 = sphi %s1375_s30, %s1802_s30   ;;  %s1271_s1 = sphi %s1373_s1, %s1801_s1  }
  0x27   : > { %1759 = sst [smem:[#allocation24_spill]] %s1279_s7  ;;  %s54_s18 = sadd.s32 1, %s1311_s15 }
  0x28   : > { %1760 = sst [smem:[#allocation25_spill]] %s1307_s14  ;;  %s888_s20 = sadd.s32 4294967294, %s1315_s16  }
  0x29   : > { %s115_s19 = sld [smem:[#allocation7 + %s1311_s15]]  ;;  %p56_p10 = scmp.ge.s32.totalorder %s54_s18, 2 }
  0x2a   : > { %s129_s21 = sadd.s32 1, %s1303_s13  ;;  %p136_p11 = scmp.ne.s32.totalorder %s1303_s13, %s1299_s12 }
  0x2b   : > { %s1812_s18 = smov (%p56_p10, %s54_s18), 0  ;;  %p1751_p12 = scmp.eq.s32.totalorder %s1315_s16, 0 }
  0x2c   : > { %1761 = sst [smem:[#allocation26_spill]] %s1812_s18  ;;  %p142_p13 = scmp.ne.s32.totalorder %s1299_s12, %s1295_s11 }
  0x2d   : > { %s120_s22 = sld [smem:[#allocation7 + %s1812_s18]]  ;;  %s1445_s23 = ssub.s32 %s1311_s15, %s1812_s18 }
  0x2e   : > { %p1447_p0 = scmp.eq.s32.totalorder %s887_s17, 0  ;;  %p193_p2 = scmp.eq.s32.totalorder %s1445_s23, 0 }
  0x2f   : > { %s889_s24 = sadd.s32 4294967295, %s115_s19  ;;  %s195_s27 = sadd.s32 1, %s1279_s7 }
  0x30   : > { %p890_p1 = scmp.gt.s32.totalorder %s889_s24, 0  ;;  %p1454_p3 = por %p1447_p0, %p142_p13 }
  0x31   : > { %s1460_s28 = scalar_select %p193_p2, %s1279_s7, %s195_s27  }
  0x32   : > { %s1763_s26 = scalar_select %p1454_p3, 1, 0 }
  0x33   : > { %s1814_s24 = smov (%p890_p1, %s889_s24), 0  ;;  %1764 = sst [smem:[#allocation27_spill]] %s1460_s28 }
  0x34   : > { %s891_s29 = sadd.s32 4294967295, %s120_s22  ;;  %p205_p4 = scmp.ne.s32.totalorder %s1279_s7, %s1275_s30 }
  0x35   : > { %p892_p5 = scmp.gt.s32.totalorder %s891_s29, 0  ;;  %p206_p6 = scmp.eq.s32.totalorder %s887_s17, 1 }
  0x36   : > { %p211_p7 = scmp.ne.s32.totalorder %s1275_s30, %s1271_s1  ;;  %p212_p8 = scmp.eq.s32.totalorder %s888_s20, 1 }
  0x37   : > { %s1816_s29 = smov (%p892_p5, %s891_s29), 0  ;;  %p1466_p9 = por %p206_p6, %p205_p4 }
  0x38   : > { %p1470_p10 = por %p212_p8, %p211_p7  ;;  %s125_s19 = ssub.s32 %s1814_s24, %s1816_s29 }
  0x39   : > { %s1765_s0 = scalar_select %p1466_p9, 1, 0 }
  0x3a   : > { %s1767_s11 = scalar_select %p1470_p10, 1, 0 }
  0x3b   : > { %1766 = sst [smem:[#allocation28_spill]] %s1765_s0  ;;  %s126_s22 = sor.u32 %s125_s19, %s1445_s23 }
  0x3c   : > { %1768 = sst [smem:[#allocation29_spill]] %s1767_s11  ;;  %p138_p1 = por %p1751_p12, %p136_p11 }
  0x3d   : > { %p127_p2 = scmp.eq.s32.totalorder %s126_s22, 0  ;;  %s1740_s17 = sand.u32 1, %s1303_s13  }
  0x3e   : > { %p1750_p5 = scmp.lt.s32.totalorder %s1315_s16, 2  ;;  %s899_s27 = sshll.u32 %s1740_s17, 3 }
  0x3f   : > { %s1486_s20 = scalar_select %p127_p2, %s1303_s13, %s129_s21  }
  0x40   : > { %p1492_p4 = pnand %p1750_p5, %p138_p1  ;;  %p907_p11 = scmp.ge.s32.totalorder %s1315_s16, 1 }
  0x41   : > { %1769 = sst [smem:[#allocation30_spill]] %s1486_s20  ;;  %p298_p6 = scmp.lt.s32.totalorder %s1315_s16, 3 }
  0x42   : > { %s951_s24 = scalar_select %p138_p1, [#allocation7], [#allocation15] }
  0x43   : > { %s952_s29 = scalar_select %p138_p1, %s1311_s15, 0 }
  0x44   : > { %s1818_s24 = smov (!%p1750_p5, %s951_s24), [#allocation17]  ;;  %s256_s19 = scalar_lea.vmem [#allocation9], %s899_s27 }
  0x45   : > { %s1820_s29 = smov (!%p1750_p5, %s952_s29), 0  ;;  %s269_s22 = sshll.u32 %s256_s19, 4  ;;  %s1513_s22 = int_to_ptr.vmem [resolvable:$true] %s269_s22 }
  0x46   : > { %s258_s21 = sld [smem:[%s1818_s24 + %s1820_s29]]  ;;  %p1503_p7 = pnand %p907_p11, %p298_p6 }
  0x47   : > { %s1508_s20 = sld [smem:[#allocation7 + %s1311_s15]]  ;;  %p180_p1 = scmp.ne.s32.totalorder %s1287_s9, %s1283_s8 }
  0x48   : > { %s1771_s17 = scalar_select %p1503_p7, 1, 0 }
  0x49   : > { %s1511_s11 = sld [smem:[#allocation7 + %s1812_s18]]  ;;  %p1521_p11 = por %p180_p1, %p1447_p0 }
  0x4a   : > { %s1774_s0 = sand.u32 1, %s1303_s13  }
  0x4b   : > { %s1772_s27 = scalar_select %p1521_p11, 1, 0 }
  0x4c   : > { %s900_s7 = sadd.s32 4294967295, %s258_s21  ;;  %s253_s3 = scalar_lea.sflag [#allocation10], %s1774_s0 }
  0x4d   : > { %p901_p8 = scmp.gt.s32.totalorder %s900_s7, 0  ;;  %s1748_s29 = sadd.s32 4294967295, %s1508_s20 }
  0x4e   : > { %p1529_p6 = scmp.gt.s32.totalorder %s1748_s29, 0  ;;  %s1130_s29 = scalar_lea.hbm %s1736_s4, 256 }
  0x4f   : > { %s1822_s7 = smov (%p901_p8, %s900_s7), 0  ;;  %s895_s8 = sadd.s32 4294967295, %s1511_s11 }
  0x50   : > { %s265_s24 = sadd.s32 %s1311_s15, %s1822_s7  ;;  %p1127_p8 = pneg %p1492_p4 }
  0x51   : > { %s902_s19 = sshll.u32 %s265_s24, 7 }
  0x52   : > { %s1773_s21 = scalar_select %p1529_p6, 1, 0 }
  0x53   : > { %s267_s6 = scalar_lea.hbm %s1736_s4, %s902_s19 }
  0x54   : > { %s1125_s25 = scalar_lea.hbm %s267_s6, 128  ;;  %p1131_p5 = scmp.lt.s32.totalorder %s267_s6, %s1736_s4 }
  0x55   : > { %p1126_p0 = scmp.ne.s32.totalorder %s267_s6, %s1125_s25  ;;  %p1132_p2 = scmp.lt.s32.totalorder %s1130_s29, %s1125_s25 }
  0x57   : > { %p1128_p1 = pnand %p1127_p8, %p1126_p0  ;;  %p1133_p12 = por %p1132_p2, %p1131_p5 }
  0x59   : > { %p1129_p13 = pneg %p1128_p1 }
  0x5b   : > { %p1134_p10 = pnand %p1133_p12, %p1129_p13 }
  0x5d   : > { %1137 = shalt.err (!%p1134_p10)
}
  0x5e   : > { %s1138_s1 = scalar_lea.vmem %s1513_s22, 128  ;;  %s1319_s18 = smov [#allocation9]  }
  0x5f   : > { %p1139_p9 = scmp.ne.s32.totalorder %s1513_s22, %s1138_s1  ;;  %s1143_s0 = sshll.u32 %s1319_s18, 4  ;;  %s1144_s0 = int_to_ptr.vmem [resolvable:$false] %s1143_s0 }
  0x60   : > { %s1145_s19 = scalar_lea.vmem %s1144_s0, 256  ;;  %p1146_p1 = scmp.lt.s32.totalorder %s1513_s22, %s1144_s0 }
  0x61   : > { %p1141_p11 = pnand %p1139_p9, %p1127_p8  ;;  %p1147_p3 = scmp.lt.s32.totalorder %s1145_s19, %s1138_s1 }
  0x63   : > { %p1142_p0 = pneg %p1141_p11  ;;  %p1148_p7 = por %p1147_p3, %p1146_p1 }
  0x65   : > { %p1149_p6 = pnand %p1148_p7, %p1142_p0 }
  0x67   : > { %1152 = shalt.err (!%p1149_p6)
}
  0x68   : > { %966 = dma.hbm_to_vmem [thread:$0]  (!%p1492_p4), %s267_s6, 128, %s1513_s22, %s253_s3  }
  0x69   : > { %s1775_s2 = sadd.s32 4294967295, %s1508_s20  ;;  %p1776_p12 = scmp.ne.s32.totalorder %s1773_s21, 0 }
  0x6a   : > { %p896_p3 = scmp.gt.s32.totalorder %s895_s8, 0  ;;  %p1777_p9 = scmp.eq.s32.totalorder %s1315_s16, 0 }
  0x6b   : > { %s1824_s2 = smov (%p1776_p12, %s1775_s2), 0  ;;  %p1778_p10 = scmp.ne.s32.totalorder %s1291_s10, %s1287_s9 }
  0x6c   : > { %s1826_s8 = smov (%p896_p3, %s895_s8), 0  ;;  %p1779_p5 = scmp.lt.s32.totalorder %s1315_s16, 2 }
  0x6d   : > { %p176_p13 = por %p1778_p10, %p1777_p9  ;;  %s163_s28 = ssub.s32 %s1824_s2, %s1826_s8 }
  0x6e   : > { %s164_s29 = sor.u32 %s163_s28, %s1445_s23  ;;  %s167_s25 = sadd.s32 1, %s1291_s10 }
  0x6f   : > { %p1568_p7 = pnand %p1779_p5, %p176_p13  ;;  %p165_p4 = scmp.eq.s32.totalorder %s164_s29, 0 }
  0x70   : > { %s954_s3 = scalar_select %p176_p13, [#allocation7], [#allocation16] }
  0x71   : > { %s1575_s6 = scalar_select %p165_p4, %s1291_s10, %s167_s25  }
  0x72   : > { %s955_s20 = scalar_select %p176_p13, %s1311_s15, 0 }
  0x73   : > { %p1781_p2 = pmov %p1779_p5  ;;  %s276_s11 = sand.u32 1, %s1291_s10  }
  0x74   : > { %s903_s21 = sshll.u32 %s276_s11, 3  ;;  %s277_s2 = scalar_lea.sflag [#allocation13], %s276_s11 }
  0x75   : > { %s1828_s3 = smov (!%p1781_p2, %s954_s3), [#allocation18]  ;;  %p1782_p11 = pmov %p1781_p2 }
  0x76   : > { %s280_s24 = scalar_lea.vmem [#allocation12], %s903_s21  ;;  %p1155_p0 = pneg %p1568_p7 }
  0x77   : > { %s1830_s20 = smov (!%p1782_p11, %s955_s20), 0  ;;  %s293_s8 = sshll.u32 %s280_s24, 4  ;;  %s1584_s8 = int_to_ptr.vmem [resolvable:$true] %s293_s8 }
  0x78   : > { %s282_s22 = sld [smem:[%s1828_s3 + %s1830_s20]]  ;;  %s1158_s3 = scalar_lea.hbm %s1737_s5, 256 }
  0x7e   : > { %s904_s7 = sadd.s32 4294967295, %s282_s22 }
  0x7f   : > { %p905_p6 = scmp.gt.s32.totalorder %s904_s7, 0 }
  0x81   : > { %s1832_s7 = smov (%p905_p6, %s904_s7), 0 }
  0x82   : > { %s289_s23 = sadd.s32 %s1311_s15, %s1832_s7 }
  0x83   : > { %s906_s1 = sshll.u32 %s289_s23, 7 }
  0x84   : > { %s291_s19 = scalar_lea.hbm %s1737_s5, %s906_s1 }
  0x85   : > { %s1153_s28 = scalar_lea.hbm %s291_s19, 128  ;;  %p1159_p3 = scmp.lt.s32.totalorder %s291_s19, %s1737_s5 }
  0x86   : > { %p1154_p8 = scmp.ne.s32.totalorder %s291_s19, %s1153_s28  ;;  %p1160_p9 = scmp.lt.s32.totalorder %s1158_s3, %s1153_s28 }
  0x88   : > { %p1156_p1 = pnand %p1155_p0, %p1154_p8  ;;  %p1161_p10 = por %p1160_p9, %p1159_p3 }
  0x8a   : > { %p1157_p12 = pneg %p1156_p1 }
  0x8c   : > { %p1162_p13 = pnand %p1161_p10, %p1157_p12 }
  0x8e   : > { %1165 = shalt.err (!%p1162_p13)
}
  0x8f   : > { %s1166_s11 = scalar_lea.vmem %s1584_s8, 128  ;;  %s1320_s21 = smov [#allocation12]  }
  0x90   : > { %p1167_p5 = scmp.ne.s32.totalorder %s1584_s8, %s1166_s11  ;;  %s1171_s7 = sshll.u32 %s1320_s21, 4  ;;  %s1172_s7 = int_to_ptr.vmem [resolvable:$false] %s1171_s7 }
  0x91   : > { %s1173_s24 = scalar_lea.vmem %s1172_s7, 256  ;;  %p1174_p11 = scmp.lt.s32.totalorder %s1584_s8, %s1172_s7 }
  0x92   : > { %p1169_p4 = pnand %p1167_p5, %p1155_p0  ;;  %p1175_p6 = scmp.lt.s32.totalorder %s1173_s24, %s1166_s11 }
  0x94   : > { %p1170_p2 = pneg %p1169_p4  ;;  %p1176_p8 = por %p1175_p6, %p1174_p11 }
  0x96   : > { %p1177_p1 = pnand %p1176_p8, %p1170_p2 }
  0x98   : > { %1180 = shalt.err (!%p1177_p1)
}
  0x99   : > { %971 = dma.hbm_to_vmem [thread:$0]  (!%p1568_p7), %s291_s19, 128, %s1584_s8, %s277_s2  }
  0x9a   : > { %p1783_p12 = scmp.ne.s32.totalorder %s1771_s17, 0 }
  0x9b   : > { %s304_s23 = sand.u32 (!%p1783_p12), 1, %s1299_s12   ;;  %p1784_p0 = scmp.ne.s32.totalorder (!%p1783_p12), %s1763_s26, 0 }
  0x9c   : > { %302 = sbr.rel (%p1783_p12) target bundleno = 1662 (0x67e), region = 36  ;;  %s908_s1 = sshll.u32 (!%p1783_p12), %s304_s23, 3 }
  0x9d   : > { %s305_s18 = scalar_lea.sflag (!%p1783_p12), [#allocation10], %s304_s23  ;;  %s308_s0 = scalar_lea.vmem (!%p1783_p12), [#allocation9], %s908_s1 }
  0xa1   : > { %1258 = dma.done.wait (%p1784_p0), %s305_s18, 128  }
  0xa2   : > { %1260 = vsyncadd (%p1784_p0), %s305_s18, 4294967168  ;;  %s313_s28 = sand.u32 1, %s1287_s9   ;;  %p1785_p7 = scmp.ne.s32.totalorder %s1772_s27, 0 }
  0xa3   : > { %s1611_s14 = sshll.u32 %s313_s28, 3  ;;  %s314_s8 = scalar_lea.sflag [#allocation13], %s313_s28 }
  0xa4   : > { %s317_s17 = scalar_lea.vmem [#allocation12], %s1611_s14 }
  0xa5   : > { %1262 = dma.done.wait (%p1785_p7), %s314_s8, 128  }
  0xa6   : > { %1264 = vsyncadd (%p1785_p7), %s314_s8, 4294967168  ;;  %s1786_s19 = sld [smem:[#allocation25_spill]]  ;;  %s358_s26 = sand.u32 1, %s1275_s30  }
  0xa7   : > { %s1625_s29 = sshll.u32 %s358_s26, 3  ;;  %s1787_s22 = sld [smem:[#allocation31_spill]] }
  0xa8   : > { %s1788_s24 = sld [smem:[#allocation32_spill]]  ;;  %s360_s1 = scalar_lea.vmem [#allocation14], %s1625_s29 }
  0xac   : > { %p361_p3 = scmp.lt.s32.totalorder %s1786_s19, 1  ;;  %s1621_s2 = sld [smem:[#allocation7 + %s1786_s19]] }
  0xad   : > { %s1628_s25 = sld [smem:[#allocation8 + %s1786_s19]] }
  0xae   : > { %s1834_s19 = smov (!%p361_p3, %s1786_s19), 1 }
  0xaf   : > { %s911_s3 = sshll.u32 %s1834_s19, 3 }
  0xb0   : > { %s367_s11 = scalar_lea.vmem %s1787_s22, %s911_s3  ;;  %s374_s23 = scalar_lea.vmem %s1788_s24, %s911_s3 }
  0xb2   : > { %p914_p9 = scmp.le.s32.totalorder %s1621_s2, 0 }
  0xb3   : > { %p918_p10 = scmp.gt.s32.totalorder (!%p914_p9), %s1628_s25, 0 }
  0xb4   : > { %391 = sbr.rel (%p914_p9) target bundleno = 1635 (0x663), region = 48 }
  0xb9   : > { %vm396_vm0 = vcmask 7168   ;;  %vm399_vm1 = vcmask 261120   ;;  %v401_v0 = vld [vmem:[%s374_s23] sm:$0xff]  ;;  %v1321_v2 = vmov -inf   ;;  %v1322_v3 = vmov 0.0  }
  0xba   : > { %v405_v1 = vld [vmem:[%s308_s0] sm:$0xff]  ;;  %397 = vst.msk [vmem:[#allocation3] sm:$0xff] %vm396_vm0, %v1321_v2  ;;  %398 = vst.msk [vmem:[#allocation4] sm:$0xff] %vm396_vm0, %v1322_v3  ;;  %936 = vmatprep.subr.mxu0 %v1322_v3  ;;  %v402_v4 = vmul.f32 0.17677669, %v401_v0  ;;  %vm1323_vm2 = vmmov 0  }
  0xbb   : > { %400 = vst.msk [vmem:[#allocation5] sm:$0xff] %vm399_vm1, %v1322_v3  ;;  %937 = vmatpush3.xpose.msk.msra.mxu0 %vm399_vm1, %v405_v1  ;;  %938 = vmatprep.mubr.msk.f32.mxu0 %vm1323_vm2, %v1322_v3 }
  0xbc   : > { %403 = vst.msk [vmem:[#allocation2] sm:$0xff] %vm399_vm1, %v402_v4 }
  0xc3   : > { %v404_v5 = vld [vmem:[#allocation2] sm:$0xff] }
  0xc4   : > { %939 = vmatmul.mubr.msk.f32.vlgmr.msra.gmra.mxu0 %vm399_vm1, %v404_v5 }
 0x182   : > { %486 = sbr.rel (%p918_p10) target bundleno = 998 (0x3e6), region = 56 }
 0x184   : > { %v1645_v6 = vpop.f32.mrf.mxu0 }
 0x186   : > { %v940_v7 = vpop.f32.mrf.mxu0 }
 0x187   : > { %v492_v8 = vld [vmem:[%s367_s11] sm:$0xff]  ;;  %v1324_v9 = vmov 0   ;;  %v488_v10 = vlaneseq  ;;  %vm499_vm3 = vcmask 64512   ;;  %v498_v15 = vld [vmem:[#allocation3] sm:$0xff]  ;;  %v530_v19 = vld [vmem:[%s317_s17] sm:$0xff]  ;;  %v1325_v20 = vmov 0.0  }
 0x188   : > { %1086 = vset.pattern.permute.xlu0 %v1324_v9  ;;  %1087 = vset.pattern.permute.xlu1 %v1324_v9  ;;  %vm1326_vm5 = vmmov 0   ;;  %v515_v28 = vld [vmem:[#allocation4] sm:$0xff]  ;;  %v523_v32 = vld [vmem:[#allocation5] sm:$0xff] }
 0x189   : > { %494 = vperm.xlu0 %1086, %v492_v8   ;;  %v489_v11 = vand.u32 127, %v488_v10  ;;  %941 = vmatprep.subr.mxu0 %v1325_v20 }
 0x18a   : > { %943 = vmatprep.mubr.msk.f32.mxu0 %vm1326_vm5, %v1325_v20  ;;  %942 = vmatpush3.msra.mxu0 %v530_v19 }
 0x204   : > { %v495_v12 = vpop.permute.xlu0 %494 }
 0x205   : > { %vm496_vm4 = vcmp.lt.s32.totalorder %v489_v11, %v495_v12 }
 0x206   : > { %v497_v13 = vsel %vm496_vm4, %v1645_v6, -1000000.0 }
 0x207   : > { %v500_v14 = vsel %vm499_vm3, %v497_v13, -inf }
 0x208   : > { %501 = vmax.xlane.f32.xlu0 %v500_v14 }
 0x291   : > { %v502_v16 = vpop.xlane.xlu0 %501 }
 0x292   : > { %v503_v17 = vmax.f32 %v498_v15, %v502_v16 }
 0x294   : > { %v504_v18 = vsub.f32 %v498_v15, %v503_v17  ;;  %606 = vst.msk [vmem:[#allocation3] sm:$0xff] %vm396_vm0, %v503_v17  ;;  %509 = vperm.xlu1 %1087, %v503_v17  }
 0x296   : > { %v505_v21 = vmul.f32 1.442695, %v504_v18 }
 0x298   : > { %1088 = vpow2.f32 %v505_v21 }
 0x2a5   : > { %v1089_v22 = vpop.eup %1088 }
 0x2a6   : > { %526 = vperm.xlu0 %1086, %v1089_v22   ;;  %v516_v29 = vmul.f32 %v1089_v22, %v515_v28 }
 0x30f   : > { %v510_v23 = vpop.permute.xlu1 %509 }
 0x310   : > { %v512_v24 = vsub.f32 %v497_v13, %v510_v23 }
 0x312   : > { %v513_v25 = vmul.f32 1.442695, %v512_v24 }
 0x314   : > { %1090 = vpow2.f32 %v513_v25 }
 0x321   : > { %v1091_v26 = vpop.eup %1090  ;;  %v527_v33 = vpop.permute.xlu0 %526 }
 0x322   : > { %944 = vmatmul.mubr.msk.f32.vlgmr.msra.gmra.mxu0 %vm499_vm3, %v1091_v26  ;;  %v517_v27 = vsel %vm499_vm3, %v1091_v26, 0.0  ;;  %v529_v34 = vmul.f32 %v527_v33, %v523_v32 }
 0x323   : > { %518 = vadd.xlane.f32.xlu1 %v517_v27 }
 0x3ac   : > { %v519_v30 = vpop.xlane.xlu1 %518 }
 0x3ad   : > { %v520_v31 = vadd.f32 %v519_v30, %v516_v29 }
 0x3af   : > { %522 = vst.msk [vmem:[#allocation4] sm:$0xff] %vm396_vm0, %v520_v31 }
 0x3e2   : > { %v600_v35 = vpop.f32.mrf.mxu0 }
 0x3e3   : > { %v604_v36 = vadd.f32 %v600_v35, %v529_v34 }
 0x3e4   : > { %v945_v37 = vpop.f32.mrf.mxu0 }
 0x3e5   : > { %605 = vst.msk [vmem:[#allocation5] sm:$0xff] %vm399_vm1, %v604_v36 }
 0x3e6 PF: > { %p921_p13 = scmp.le.s32.totalorder %s1628_s25, 0 }
 0x3e8   : > { %610 = sbr.rel (%p921_p13) target bundleno = 1485 (0x5cd), region = 60 }
 0x3ed   : > { %vm612_vm6 = vcmask 64512   ;;  %v1327_v39 = vmov 0   ;;  %v611_v40 = vld [vmem:[#allocation3] sm:$0xff]  ;;  %v643_v44 = vld [vmem:[%s317_s17] sm:$0xff]  ;;  %v1328_v45 = vmov 0.0   ;;  %vm1329_vm7 = vmmov 0  }
 0x3ee   : > { %v613_v38 = vsel %vm612_vm6, %v1645_v6, -inf  ;;  %1092 = vset.pattern.permute.xlu0 %v1327_v39  ;;  %1093 = vset.pattern.permute.xlu1 %v1327_v39  ;;  %v628_v53 = vld [vmem:[#allocation4] sm:$0xff]  ;;  %v636_v57 = vld [vmem:[#allocation5] sm:$0xff] }
 0x3ef   : > { %614 = vmax.xlane.f32.xlu0 %v613_v38  ;;  %946 = vmatprep.subr.mxu0 %v1328_v45 }
 0x3f0   : > { %948 = vmatprep.mubr.msk.f32.mxu0 %vm1329_vm7, %v1328_v45  ;;  %947 = vmatpush3.msra.mxu0 %v643_v44 }
 0x478   : > { %v615_v41 = vpop.xlane.xlu0 %614 }
 0x479   : > { %v616_v42 = vmax.f32 %v611_v40, %v615_v41 }
 0x47b   : > { %v617_v43 = vsub.f32 %v611_v40, %v616_v42  ;;  %719 = vst.msk [vmem:[#allocation3] sm:$0xff] %vm396_vm0, %v616_v42  ;;  %622 = vperm.xlu0 %1092, %v616_v42  }
 0x47d   : > { %v618_v50 = vmul.f32 1.442695, %v617_v43 }
 0x4f6   : > { %v623_v46 = vpop.permute.xlu0 %622 }
 0x4f7   : > { %v625_v47 = vsub.f32 %v1645_v6, %v623_v46 }
 0x4f9   : > { %v626_v48 = vmul.f32 1.442695, %v625_v47 }
 0x4fb   : > { %1094 = vpow2.f32 %v626_v48 }
 0x4fc   : > { %1096 = vpow2.f32 %v618_v50 }
 0x508   : > { %v1095_v49 = vpop.eup %1094 }
 0x509   : > { %949 = vmatmul.mubr.msk.f32.vlgmr.msra.gmra.mxu0 %vm612_vm6, %v1095_v49  ;;  %v630_v51 = vsel %vm612_vm6, %v1095_v49, 0.0  ;;  %v1097_v52 = vpop.eup %1096 }
 0x50a   : > { %631 = vadd.xlane.f32.xlu1 %v630_v51  ;;  %v629_v54 = vmul.f32 %v1097_v52, %v628_v53 }
 0x51b   : > { %639 = vperm.xlu1 %1093, %v1097_v52  }
 0x593   : > { %v632_v55 = vpop.xlane.xlu1 %631 }
 0x594   : > { %v633_v56 = vadd.f32 %v632_v55, %v629_v54 }
 0x596   : > { %635 = vst.msk [vmem:[#allocation4] sm:$0xff] %vm396_vm0, %v633_v56 }
 0x597   : > { %v640_v58 = vpop.permute.xlu1 %639 }
 0x598   : > { %v642_v59 = vmul.f32 %v640_v58, %v636_v57 }
 0x5c9   : > { %v713_v60 = vpop.f32.mrf.mxu0 }
 0x5ca   : > { %v717_v61 = vadd.f32 %v713_v60, %v642_v59 }
 0x5cb   : > { %v950_v62 = vpop.f32.mrf.mxu0 }
 0x5cc   : > { %718 = vst.msk [vmem:[#allocation5] sm:$0xff] %vm399_vm1, %v717_v61 }
 0x5cd PF: > { %s923_s18 = sadd.s32 4294967295, %s1621_s2 }
 0x5ce   : > { %p925_p5 = scmp.ne.s32.totalorder %s923_s18, 0 }
 0x5d0   : > { %724 = sbr.rel (%p925_p5) target bundleno = 1635 (0x663), region = 64 }
 0x5d5   : > { %v725_v63 = vld [vmem:[#allocation4] sm:$0xff]  ;;  %v1330_v0 = vmov 0   ;;  %v727_v2 = vld [vmem:[#allocation5] sm:$0xff] }
 0x5d6   : > { %1098 = vset.pattern.permute.xlu0 %v1330_v0  ;;  %1099 = vrcp.f32 %v725_v63 }
 0x5e3   : > { %v1100_v1 = vpop.eup %1099 }
 0x5e4   : > { %730 = vperm.xlu0 %1098, %v1100_v1  }
 0x65f   : > { %v731_v3 = vpop.permute.xlu0 %730 }
 0x660   : > { %v733_v4 = vmul.f32 %v731_v3, %v727_v2 }
 0x662   : > { %734 = vst.msk [vmem:[%s360_s1] sm:$0xff] %vm399_vm1, %v733_v4 }
 0x663 PF: > { %s1789_s0 = sld [smem:[#allocation25_spill]]  ;;  %s750_s25 = sshll.u32 %s360_s1, 4  ;;  %s751_s25 = int_to_ptr.vmem [resolvable:$true] %s750_s25 }
 0x664   : > { %s1790_s28 = sld [smem:[#allocation28_spill]]  ;;  %s736_s3 = scalar_lea.sflag [#allocation11], %s358_s26 }
 0x665   : > { %s1791_s19 = sld [smem:[#allocation33_spill]]  ;;  %s1181_s27 = scalar_lea.vmem %s751_s25, 128 }
 0x666   : > { %p1182_p4 = scmp.ne.s32.totalorder %s751_s25, %s1181_s27  ;;  %s1331_s20 = smov [#allocation14]  }
 0x667   : > { %s1185_s22 = sshll.u32 %s1331_s20, 4  ;;  %s1186_s22 = int_to_ptr.vmem [resolvable:$false] %s1185_s22 }
 0x668   : > { %s1187_s11 = scalar_lea.vmem %s1186_s22, 256  ;;  %p1188_p8 = scmp.lt.s32.totalorder %s751_s25, %s1186_s22 }
 0x669   : > { %s927_s14 = sshll.u32 %s1789_s0, 7  ;;  %p1189_p1 = scmp.lt.s32.totalorder %s1187_s11, %s1181_s27 }
 0x66a   : > { %p1792_p2 = scmp.ne.s32.totalorder %s1790_s28, 0 }
 0x66b   : > { %s748_s2 = scalar_lea.hbm %s1791_s19, %s927_s14  ;;  %p1190_p12 = por %p1189_p1, %p1188_p8 }
 0x66c   : > { %p1183_p11 = pnand %p1182_p4, %p1792_p2 }
 0x66e   : > { %p1184_p6 = pneg %p1183_p11 }
 0x670   : > { %p1191_p0 = pnand %p1190_p12, %p1184_p6 }
 0x672   : > { %1194 = shalt.err (!%p1191_p0)
}
 0x673   : > { %s1195_s21 = scalar_lea.hbm %s748_s2, 128  ;;  %s1199_s7 = scalar_lea.hbm %s1791_s19, 256 }
 0x674   : > { %p1196_p7 = scmp.ne.s32.totalorder %s748_s2, %s1195_s21  ;;  %p1200_p10 = scmp.lt.s32.totalorder %s748_s2, %s1791_s19 }
 0x675   : > { %p1201_p13 = scmp.lt.s32.totalorder %s1199_s7, %s1195_s21 }
 0x676   : > { %p1197_p3 = pnand %p1196_p7, %p1792_p2 }
 0x677   : > { %p1202_p5 = por %p1201_p13, %p1200_p10 }
 0x678   : > { %p1198_p9 = pneg %p1197_p3 }
 0x67a   : > { %p1203_p4 = pnand %p1202_p5, %p1198_p9 }
 0x67c   : > { %1206 = shalt.err (!%p1203_p4)
}
 0x67d   : > { %959 = dma.vmem_to_hbm [thread:$0]  (%p1792_p2), %s751_s25, 128, %s748_s2, %s736_s3  }
 0x67e PF: > { %s1793_s1 = sld [smem:[#allocation23_spill]]  ;;  %p1796_p6 = scmp.ge.s32.totalorder %s1315_s16, 2 }
 0x67f   : > { %s1794_s18 = sld [smem:[#allocation29_spill]] }
 0x684   : > { %s762_s0 = sand.u32 1, %s1793_s1  }
 0x685   : > { %p1795_p11 = scmp.ne.s32.totalorder %s1794_s18, 0  ;;  %s763_s14 = scalar_lea.sflag [#allocation11], %s762_s0 }
 0x687   : > { %p973_p8 = pnand %p1796_p6, %p1795_p11 }
 0x689   : > { %p974_p1 = pneg %p973_p8 }
 0x68b   : > { %1266 = dma.done.wait (%p974_p1), %s763_s14, 128  }
 0x68c   : > { %1268 = vsyncadd (%p974_p1), %s763_s14, 4294967168  ;;  %s35_s16 = sadd.s32 1, %s1315_s16   ;;  %s1797_s8 = sld [smem:[#allocation24_spill]] }
 0x68d   : > { %p32_p12 = scmp.ge.s32.totalorder %s35_s16, 4   ;;  %s1798_s7 = sld [smem:[#allocation27_spill]] }
 0x68e   : > { %s1799_s28 = sld [smem:[#allocation30_spill]]  ;;  %s1801_s1 = smov %s1275_s30 }
 0x68f   : > { %s1800_s17 = sld [smem:[#allocation26_spill]]  ;;  %s1806_s11 = smov %s1299_s12 }
 0x690   : > { %s1807_s12 = smov %s1303_s13  ;;  %s1809_s14 = smov %s1311_s15 }
 0x691   :  { %34 = sbr.rel (!%p32_p12) target bundleno = 38 (0x26), region = 120 }
 0x692   : > { %s1802_s30 = smov %s1797_s8  ;;  %s1803_s8 = smov %s1287_s9 }
 0x693   : > { %s1804_s9 = smov %s1291_s10  ;;  %s1805_s10 = smov %s1575_s6 }
 0x694   : > { %s1808_s13 = smov %s1799_s28 }
 0x695   : > { %s1810_s15 = smov %s1800_s17 }
 0x696   :  { %768 = vsyncpa [#allocation10], 1 }
 0x697   :  { %770 = vsyncpa [#allocation10 + $0x1], 1 }
 0x698   :  { %771 = vsyncpa [#allocation13], 1 }
 0x699   :  { %773 = vsyncpa [#allocation13 + $0x1], 1 }
 0x69a   :  { %774 = vsyncpa [#allocation11], 1 }
 0x69b   :  { %776 = vsyncpa [#allocation11 + $0x1], 1 }

</bundles_post_ra>
